<compile_context>
chip_gen: v5e
topology: v5e:2x2
jax: 0.10.0
libtpu: 0.0.40
codegen_flags: <defaults>
</compile_context>

<pallas_src>
import functools

import jax
import jax.numpy as jnp
from jax.experimental import pallas as pl
from jax.experimental.pallas import tpu as pltpu


def _l2_normalize(x):
    # matches torch l2_norm: x / sqrt(sum(x^2, axis=1) + 1e-12)
    normp = jnp.sum(x * x, axis=1, keepdims=True) + 1e-12
    return x * jax.lax.rsqrt(normp)


def proxy_anchor_kernel(alpha, n_classes, tile_c,
                        x_ref, p_ref, m_ref, onehot_ref,
                        mrgp_ref, poscos_ref, negcos_ref,
                        lpos_ref, lneg_ref, haspos_ref):
    tile = pl.program_id(0)

    X = x_ref[...]            # (B, D)   resident across tiles
    P = p_ref[...]            # (TILE_C, D) streamed
    M = m_ref[...]            # (TILE_C, D) streamed
    onehot = onehot_ref[...]  # (B, TILE_C) 0/1 float, padded classes are all-zero

    Xh = _l2_normalize(X)
    Ph = _l2_normalize(P)
    Mh = _l2_normalize(M)

    # contract the shared D axis directly (A @ B^T without an in-kernel transpose)
    dn = (((1,), (1,)), ((), ()))
    cos = jnp.clip(
        jax.lax.dot_general(Xh, Ph, dn, preferred_element_type=jnp.float32),
        -1.0, 1.0)                                                    # (B, TILE_C)
    x_mrg_cos = jnp.clip(
        jax.lax.dot_general(Xh, Mh, dn, preferred_element_type=jnp.float32),
        -1.0, 1.0)                                                    # (B, TILE_C)

    # diag(cos_sim(mrg, P)) as an elementwise row-dot; the ones-row matmul reduces over D
    # and leaves the result directly in (1, TILE_C) lane layout.
    prod = Mh * Ph                                                    # (TILE_C, D)
    ones_row = jnp.ones((1, prod.shape[1]), jnp.float32)
    mrg_p_cos = jnp.clip(
        jax.lax.dot_general(ones_row, prod, dn, preferred_element_type=jnp.float32),
        -1.0, 1.0)                                                    # (1, TILE_C)

    diff = cos - mrg_p_cos
    inner = cos > mrg_p_cos
    pos_cos = jnp.where(inner, x_mrg_cos, diff)
    neg_cos = jnp.where(inner, diff, x_mrg_cos)

    # per-class validity mask: lanes that only exist because C was padded to a multiple
    # of TILE_C must not contribute to the negative term.
    lane = jax.lax.broadcasted_iota(jnp.int32, (1, onehot.shape[1]), 1)
    valid = ((lane + tile * tile_c) < n_classes).astype(jnp.float32)  # (1, TILE_C)

    neg_big = jnp.float32(1e30)

    def log1p_sum_exp(logits, mask01):
        # log(1 + sum_i mask_i * exp(logits_i)) per class, numerically stable.
        # mask01 is a 0/1 float, so masking is pure arithmetic (no compare+select).
        masked = logits + (mask01 - 1.0) * neg_big        # mask==1 -> logits, mask==0 -> ~-1e30
        m = jnp.maximum(jnp.max(masked, axis=0, keepdims=True), 0.0)
        s = jnp.sum(jnp.exp(masked - m), axis=0, keepdims=True)
        return m + jnp.log(jnp.exp(-m) + s)               # (1, TILE_C)

    lpos = log1p_sum_exp(-alpha * pos_cos, onehot)                    # log(1 + P_sim_sum)
    lneg = log1p_sum_exp(alpha * neg_cos, (1.0 - onehot) * valid)     # log(1 + N_sim_sum)

    counts = jnp.sum(onehot, axis=0, keepdims=True)
    has_pos = (counts > 0.0).astype(jnp.float32)                      # (1, TILE_C)

    mrgp_ref[...] = mrg_p_cos
    poscos_ref[...] = pos_cos
    negcos_ref[...] = neg_cos
    lpos_ref[...] = lpos
    lneg_ref[...] = lneg
    haspos_ref[...] = has_pos


def proxy_anchor_forward(X, T, proxies, mrg, *, alpha=64.0, tile_c=128):
    """Returns (loss, P, mrg, mrg_P_cos, pos_cos, neg_cos) like the torch module."""
    X = jnp.asarray(X, jnp.float32)
    proxies = jnp.asarray(proxies, jnp.float32)
    mrg = jnp.asarray(mrg, jnp.float32)
    B, D = X.shape
    C, _ = proxies.shape

    # binarize(T, n_classes) with last column forced to 1 (as in the torch module).
    one_hot = jax.nn.one_hot(T, C, dtype=jnp.float32)
    one_hot = one_hot.at[:, -1].set(1.0)

    # pad the class dim to a multiple of TILE_C (lane-dense blocks).
    n_tiles = pl.cdiv(C, tile_c)
    c_pad = n_tiles * tile_c
    pad_c = c_pad - C
    proxies_padded = jnp.pad(proxies, ((0, pad_c), (0, 0)))
    mrg_padded = jnp.pad(mrg, ((0, pad_c), (0, 0)))
    one_hot_padded = jnp.pad(one_hot, ((0, 0), (0, pad_c)))

    kernel = functools.partial(proxy_anchor_kernel, float(alpha), int(C), int(tile_c))

    out_shapes = (
        jax.ShapeDtypeStruct((1, c_pad), jnp.float32),   # mrg_P_cos (diag)
        jax.ShapeDtypeStruct((B, c_pad), jnp.float32),   # pos_cos
        jax.ShapeDtypeStruct((B, c_pad), jnp.float32),   # neg_cos
        jax.ShapeDtypeStruct((1, c_pad), jnp.float32),   # per-class log(1 + P_sim_sum)
        jax.ShapeDtypeStruct((1, c_pad), jnp.float32),   # per-class log(1 + N_sim_sum)
        jax.ShapeDtypeStruct((1, c_pad), jnp.float32),   # per-class has-positive indicator
    )

    mrg_p_cos, pos_cos, neg_cos, lpos, lneg, has_pos = pl.pallas_call(
        kernel,
        out_shape=out_shapes,
        grid=(n_tiles,),
        in_specs=[
            pl.BlockSpec((B, D), lambda i: (0, 0)),        # X (resident, reused each tile)
            pl.BlockSpec((tile_c, D), lambda i: (i, 0)),   # proxies, streamed over classes
            pl.BlockSpec((tile_c, D), lambda i: (i, 0)),   # mrg, streamed over classes
            pl.BlockSpec((B, tile_c), lambda i: (0, i)),   # one-hot labels
        ],
        out_specs=(
            pl.BlockSpec((1, tile_c), lambda i: (0, i)),
            pl.BlockSpec((B, tile_c), lambda i: (0, i)),
            pl.BlockSpec((B, tile_c), lambda i: (0, i)),
            pl.BlockSpec((1, tile_c), lambda i: (0, i)),
            pl.BlockSpec((1, tile_c), lambda i: (0, i)),
            pl.BlockSpec((1, tile_c), lambda i: (0, i)),
        ),
        compiler_params=pltpu.CompilerParams(
            dimension_semantics=("parallel",),             # class tiles are independent (v7x megacore)
            vmem_limit_bytes=32 * 1024 * 1024,
        ),
    )(X, proxies_padded, mrg_padded, one_hot_padded)

    # tiny O(C) epilogue: combine per-tile partial loss terms (kept outside so the
    # class grid axis stays 'parallel'; padded classes contribute exactly 0).
    num_valid = jnp.sum(has_pos)
    pos_term = jnp.sum(lpos) / num_valid
    neg_term = jnp.sum(lneg) / float(C)
    loss = pos_term + neg_term

    return (loss, proxies, mrg,
            mrg_p_cos[0, :C], pos_cos[:, :C], neg_cos[:, :C])


def _reference(X, T, proxies, mrg, alpha, n_classes):
    """Pure-JAX reference (same stable log-domain math; the naive exp overflows f32)."""
    def l2n(x):
        return x / jnp.sqrt(jnp.sum(x * x, axis=1, keepdims=True) + 1e-12)
    Xh, Ph, Mh = l2n(X), l2n(proxies), l2n(mrg)
    cos = jnp.clip(Xh @ Ph.T, -1.0, 1.0)
    x_mrg = jnp.clip(Xh @ Mh.T, -1.0, 1.0)
    mrg_p = jnp.clip(jnp.sum(Mh * Ph, axis=1), -1.0, 1.0)
    onehot = jax.nn.one_hot(T, n_classes, dtype=jnp.float32).at[:, -1].set(1.0)
    inner = cos > mrg_p[None, :]
    pos_cos = jnp.where(inner, x_mrg, cos - mrg_p[None, :])
    neg_cos = jnp.where(inner, cos - mrg_p[None, :], x_mrg)

    def log1p_sum_exp(logits, mask01):
        masked = logits + (mask01 - 1.0) * 1e30
        m = jnp.maximum(jnp.max(masked, axis=0), 0.0)
        s = jnp.sum(jnp.exp(masked - m[None, :]), axis=0)
        return m + jnp.log(jnp.exp(-m) + s)

    lpos = log1p_sum_exp(-alpha * pos_cos, onehot)
    lneg = log1p_sum_exp(alpha * neg_cos, 1.0 - onehot)
    num_valid = jnp.sum((jnp.sum(onehot, axis=0) > 0).astype(jnp.float32))
    loss = jnp.sum(lpos) / num_valid + jnp.sum(lneg) / n_classes
    return loss, mrg_p, pos_cos, neg_cos


if __name__ == "__main__":
    key = jax.random.PRNGKey(0)
    kx, kp, kt = jax.random.split(key, 3)

    B, C, D = 8, 8, 32          # batch, n_classes, hidden_size
    alpha = 64.0

    # kaiming_normal_(mode='fan_out') on (n_classes, hidden_size) -> std = sqrt(2 / n_classes)
    proxies = jax.random.normal(kp, (C, D), dtype=jnp.float32) * jnp.sqrt(2.0 / C)
    mrg = proxies               # module copies proxies into self.mrg at init
    X = jax.random.normal(kx, (B, D), dtype=jnp.float32)
    T = jax.random.randint(kt, (B,), 0, C, dtype=jnp.int32)

    loss, P_out, mrg_out, mrg_p_cos, pos_cos, neg_cos = proxy_anchor_forward(
        X, T, proxies, mrg, alpha=alpha)
    jax.block_until_ready((loss, mrg_p_cos, pos_cos, neg_cos))

    ref_loss, ref_mrg_p, ref_pos, ref_neg = _reference(X, T, proxies, mrg, alpha, C)

    assert loss.shape == () and bool(jnp.isfinite(loss))
    assert mrg_p_cos.shape == (C,)
    assert pos_cos.shape == (B, C) and neg_cos.shape == (B, C)
    assert bool(jnp.all(jnp.isfinite(pos_cos))) and bool(jnp.all(jnp.isfinite(neg_cos)))
    assert jnp.allclose(mrg_p_cos, ref_mrg_p, atol=1e-4, rtol=1e-4)
    assert jnp.allclose(pos_cos, ref_pos, atol=1e-4, rtol=1e-4)
    assert jnp.allclose(neg_cos, ref_neg, atol=1e-4, rtol=1e-4)
    assert jnp.allclose(loss, ref_loss, atol=1e-3, rtol=1e-3)

    print("KERNEL_OK")
</pallas_src>

<mosaic_0001>
module attributes {stable_mosaic.version = 11 : i64} {
  func.func @proxy_anchor_kernel(%arg0: i32, %arg1: memref<8x32xf32, #tpu.memory_space<vmem>>, %arg2: memref<128x32xf32, #tpu.memory_space<vmem>>, %arg3: memref<128x32xf32, #tpu.memory_space<vmem>>, %arg4: memref<8x128xf32, #tpu.memory_space<vmem>>, %arg5: memref<1x128xf32, #tpu.memory_space<vmem>>, %arg6: memref<8x128xf32, #tpu.memory_space<vmem>>, %arg7: memref<8x128xf32, #tpu.memory_space<vmem>>, %arg8: memref<1x128xf32, #tpu.memory_space<vmem>>, %arg9: memref<1x128xf32, #tpu.memory_space<vmem>>, %arg10: memref<1x128xf32, #tpu.memory_space<vmem>>) attributes {dimension_semantics = [#tpu.dimension_semantics<parallel>], iteration_bounds = array<i64: 1>, scalar_prefetch = 0 : i64, scratch_operands = 0 : i64, tpu.core_type = #tpu.core_type<tc>, window_params = [{pipeline_mode = #tpu.pipeline_mode<synchronous>, transform_indices = @transform_0, window_bounds = array<i64: 8, 32>}, {transform_indices = @transform_1, window_bounds = array<i64: 128, 32>}, {transform_indices = @transform_2, window_bounds = array<i64: 128, 32>}, {transform_indices = @transform_3, window_bounds = array<i64: 8, 128>}, {transform_indices = @transform_4, window_bounds = array<i64: 1, 128>}, {transform_indices = @transform_5, window_bounds = array<i64: 8, 128>}, {transform_indices = @transform_6, window_bounds = array<i64: 8, 128>}, {transform_indices = @transform_7, window_bounds = array<i64: 1, 128>}, {transform_indices = @transform_8, window_bounds = array<i64: 1, 128>}, {transform_indices = @transform_9, window_bounds = array<i64: 1, 128>}]} {
    %c0 = arith.constant 0 : index
    %c0_0 = arith.constant 0 : index
    %0 = vector.load %arg1[%c0, %c0_0] : memref<8x32xf32, #tpu.memory_space<vmem>>, vector<8x32xf32>
    %c0_1 = arith.constant 0 : index
    %c0_2 = arith.constant 0 : index
    %1 = vector.load %arg2[%c0_1, %c0_2] : memref<128x32xf32, #tpu.memory_space<vmem>>, vector<128x32xf32>
    %c0_3 = arith.constant 0 : index
    %c0_4 = arith.constant 0 : index
    %2 = vector.load %arg3[%c0_3, %c0_4] : memref<128x32xf32, #tpu.memory_space<vmem>>, vector<128x32xf32>
    %c0_5 = arith.constant 0 : index
    %c0_6 = arith.constant 0 : index
    %3 = vector.load %arg4[%c0_5, %c0_6] : memref<8x128xf32, #tpu.memory_space<vmem>>, vector<8x128xf32>
    %4 = arith.mulf %0, %0 : vector<8x32xf32>
    %cst = arith.constant dense<0.000000e+00> : vector<8xf32>
    %5 = vector.multi_reduction <add>, %4, %cst [1] : vector<8x32xf32> to vector<8xf32>
    %6 = vector.shape_cast %5 : vector<8xf32> to vector<8x1xf32>
    %cst_7 = arith.constant 9.99999996E-13 : f32
    %7 = vector.broadcast %cst_7 : f32 to vector<8x1xf32>
    %8 = arith.addf %6, %7 : vector<8x1xf32>
    %9 = math.rsqrt %8 : vector<8x1xf32>
    %10 = vector.broadcast %9 : vector<8x1xf32> to vector<8x32xf32>
    %11 = arith.mulf %0, %10 : vector<8x32xf32>
    %12 = arith.mulf %1, %1 : vector<128x32xf32>
    %cst_8 = arith.constant dense<0.000000e+00> : vector<128xf32>
    %13 = vector.multi_reduction <add>, %12, %cst_8 [1] : vector<128x32xf32> to vector<128xf32>
    %14 = vector.shape_cast %13 : vector<128xf32> to vector<128x1xf32>
    %cst_9 = arith.constant 9.99999996E-13 : f32
    %15 = vector.broadcast %cst_9 : f32 to vector<128x1xf32>
    %16 = arith.addf %14, %15 : vector<128x1xf32>
    %17 = math.rsqrt %16 : vector<128x1xf32>
    %18 = vector.broadcast %17 : vector<128x1xf32> to vector<128x32xf32>
    %19 = arith.mulf %1, %18 : vector<128x32xf32>
    %20 = arith.mulf %2, %2 : vector<128x32xf32>
    %cst_10 = arith.constant dense<0.000000e+00> : vector<128xf32>
    %21 = vector.multi_reduction <add>, %20, %cst_10 [1] : vector<128x32xf32> to vector<128xf32>
    %22 = vector.shape_cast %21 : vector<128xf32> to vector<128x1xf32>
    %cst_11 = arith.constant 9.99999996E-13 : f32
    %23 = vector.broadcast %cst_11 : f32 to vector<128x1xf32>
    %24 = arith.addf %22, %23 : vector<128x1xf32>
    %25 = math.rsqrt %24 : vector<128x1xf32>
    %26 = vector.broadcast %25 : vector<128x1xf32> to vector<128x32xf32>
    %27 = arith.mulf %2, %26 : vector<128x32xf32>
    %cst_12 = arith.constant dense<0.000000e+00> : vector<8x128xf32>
    %28 = tpu.matmul %11, %19, %cst_12 {dimension_numbers = #tpu.dot_dimension_numbers<[1], [1], [0], [0], [0, 0, 1, 0], [], []>} : vector<8x32xf32>, vector<128x32xf32>, vector<8x128xf32> -> vector<8x128xf32>
    %cst_13 = arith.constant -1.000000e+00 : f32
    %cst_14 = arith.constant 1.000000e+00 : f32
    %29 = vector.broadcast %cst_13 : f32 to vector<8x128xf32>
    %30 = arith.maximumf %29, %28 : vector<8x128xf32>
    %31 = vector.broadcast %cst_14 : f32 to vector<8x128xf32>
    %32 = arith.minimumf %31, %30 : vector<8x128xf32>
    %cst_15 = arith.constant dense<0.000000e+00> : vector<8x128xf32>
    %33 = tpu.matmul %11, %27, %cst_15 {dimension_numbers = #tpu.dot_dimension_numbers<[1], [1], [0], [0], [0, 0, 1, 0], [], []>} : vector<8x32xf32>, vector<128x32xf32>, vector<8x128xf32> -> vector<8x128xf32>
    %cst_16 = arith.constant -1.000000e+00 : f32
    %cst_17 = arith.constant 1.000000e+00 : f32
    %34 = vector.broadcast %cst_16 : f32 to vector<8x128xf32>
    %35 = arith.maximumf %34, %33 : vector<8x128xf32>
    %36 = vector.broadcast %cst_17 : f32 to vector<8x128xf32>
    %37 = arith.minimumf %36, %35 : vector<8x128xf32>
    %38 = arith.mulf %27, %19 : vector<128x32xf32>
    %cst_18 = arith.constant 1.000000e+00 : f32
    %39 = vector.broadcast %cst_18 : f32 to vector<1x32xf32>
    %cst_19 = arith.constant dense<0.000000e+00> : vector<1x128xf32>
    %40 = tpu.matmul %39, %38, %cst_19 {dimension_numbers = #tpu.dot_dimension_numbers<[1], [1], [0], [0], [0, 0, 1, 0], [], []>} : vector<1x32xf32>, vector<128x32xf32>, vector<1x128xf32> -> vector<1x128xf32>
    %cst_20 = arith.constant -1.000000e+00 : f32
    %cst_21 = arith.constant 1.000000e+00 : f32
    %41 = vector.broadcast %cst_20 : f32 to vector<1x128xf32>
    %42 = arith.maximumf %41, %40 : vector<1x128xf32>
    %43 = vector.broadcast %cst_21 : f32 to vector<1x128xf32>
    %44 = arith.minimumf %43, %42 : vector<1x128xf32>
    %45 = vector.broadcast %44 : vector<1x128xf32> to vector<8x128xf32>
    %46 = arith.subf %32, %45 : vector<8x128xf32>
    %47 = vector.broadcast %44 : vector<1x128xf32> to vector<8x128xf32>
    %48 = arith.cmpf ogt, %32, %47 : vector<8x128xf32>
    %49 = arith.select %48, %37, %46 : vector<8x128xi1>, vector<8x128xf32>
    %50 = arith.select %48, %46, %37 : vector<8x128xi1>, vector<8x128xf32>
    %51 = tpu.iota {dimensions = array<i32: 1>} : vector<1x128xi32>
    %c128_i32 = arith.constant 128 : i32
    %52 = arith.muli %arg0, %c128_i32 : i32
    %53 = vector.broadcast %52 : i32 to vector<1x128xi32>
    %54 = arith.addi %51, %53 : vector<1x128xi32>
    %c8_i32 = arith.constant 8 : i32
    %55 = vector.broadcast %c8_i32 : i32 to vector<1x128xi32>
    %56 = arith.cmpi slt, %54, %55 : vector<1x128xi32>
    %57 = arith.extui %56 : vector<1x128xi1> to vector<1x128xi32>
    %58 = arith.sitofp %57 : vector<1x128xi32> to vector<1x128xf32>
    %cst_22 = arith.constant -6.400000e+01 : f32
    %59 = vector.broadcast %cst_22 : f32 to vector<8x128xf32>
    %60 = arith.mulf %59, %49 : vector<8x128xf32>
    %cst_23 = arith.constant 1.000000e+00 : f32
    %61 = vector.broadcast %cst_23 : f32 to vector<8x128xf32>
    %62 = arith.subf %3, %61 : vector<8x128xf32>
    %cst_24 = arith.constant 1.000000e+30 : f32
    %63 = vector.broadcast %cst_24 : f32 to vector<8x128xf32>
    %64 = arith.mulf %62, %63 : vector<8x128xf32>
    %65 = arith.addf %60, %64 : vector<8x128xf32>
    %cst_25 = arith.constant dense<0xFF800000> : vector<128xf32>
    %66 = vector.multi_reduction <maximumf>, %65, %cst_25 [0] : vector<8x128xf32> to vector<128xf32>
    %67 = vector.shape_cast %66 : vector<128xf32> to vector<1x128xf32>
    %cst_26 = arith.constant 0.000000e+00 : f32
    %68 = vector.broadcast %cst_26 : f32 to vector<1x128xf32>
    %69 = arith.maximumf %67, %68 : vector<1x128xf32>
    %70 = vector.broadcast %69 : vector<1x128xf32> to vector<8x128xf32>
    %71 = arith.subf %65, %70 : vector<8x128xf32>
    %72 = math.exp %71 : vector<8x128xf32>
    %cst_27 = arith.constant dense<0.000000e+00> : vector<128xf32>
    %73 = vector.multi_reduction <add>, %72, %cst_27 [0] : vector<8x128xf32> to vector<128xf32>
    %74 = vector.shape_cast %73 : vector<128xf32> to vector<1x128xf32>
    %cst_28 = arith.constant 0.000000e+00 : f32
    %75 = vector.broadcast %cst_28 : f32 to vector<1x128xf32>
    %76 = arith.subf %75, %69 : vector<1x128xf32>
    %77 = math.exp %76 : vector<1x128xf32>
    %78 = arith.addf %77, %74 : vector<1x128xf32>
    %79 = math.log %78 : vector<1x128xf32>
    %80 = arith.addf %69, %79 : vector<1x128xf32>
    %cst_29 = arith.constant 6.400000e+01 : f32
    %81 = vector.broadcast %cst_29 : f32 to vector<8x128xf32>
    %82 = arith.mulf %81, %50 : vector<8x128xf32>
    %cst_30 = arith.constant 1.000000e+00 : f32
    %83 = vector.broadcast %cst_30 : f32 to vector<8x128xf32>
    %84 = arith.subf %83, %3 : vector<8x128xf32>
    %85 = vector.broadcast %58 : vector<1x128xf32> to vector<8x128xf32>
    %86 = arith.mulf %84, %85 : vector<8x128xf32>
    %cst_31 = arith.constant 1.000000e+00 : f32
    %87 = vector.broadcast %cst_31 : f32 to vector<8x128xf32>
    %88 = arith.subf %86, %87 : vector<8x128xf32>
    %cst_32 = arith.constant 1.000000e+30 : f32
    %89 = vector.broadcast %cst_32 : f32 to vector<8x128xf32>
    %90 = arith.mulf %88, %89 : vector<8x128xf32>
    %91 = arith.addf %82, %90 : vector<8x128xf32>
    %cst_33 = arith.constant dense<0xFF800000> : vector<128xf32>
    %92 = vector.multi_reduction <maximumf>, %91, %cst_33 [0] : vector<8x128xf32> to vector<128xf32>
    %93 = vector.shape_cast %92 : vector<128xf32> to vector<1x128xf32>
    %cst_34 = arith.constant 0.000000e+00 : f32
    %94 = vector.broadcast %cst_34 : f32 to vector<1x128xf32>
    %95 = arith.maximumf %93, %94 : vector<1x128xf32>
    %96 = vector.broadcast %95 : vector<1x128xf32> to vector<8x128xf32>
    %97 = arith.subf %91, %96 : vector<8x128xf32>
    %98 = math.exp %97 : vector<8x128xf32>
    %cst_35 = arith.constant dense<0.000000e+00> : vector<128xf32>
    %99 = vector.multi_reduction <add>, %98, %cst_35 [0] : vector<8x128xf32> to vector<128xf32>
    %100 = vector.shape_cast %99 : vector<128xf32> to vector<1x128xf32>
    %cst_36 = arith.constant 0.000000e+00 : f32
    %101 = vector.broadcast %cst_36 : f32 to vector<1x128xf32>
    %102 = arith.subf %101, %95 : vector<1x128xf32>
    %103 = math.exp %102 : vector<1x128xf32>
    %104 = arith.addf %103, %100 : vector<1x128xf32>
    %105 = math.log %104 : vector<1x128xf32>
    %106 = arith.addf %95, %105 : vector<1x128xf32>
    %cst_37 = arith.constant dense<0.000000e+00> : vector<128xf32>
    %107 = vector.multi_reduction <add>, %3, %cst_37 [0] : vector<8x128xf32> to vector<128xf32>
    %108 = vector.shape_cast %107 : vector<128xf32> to vector<1x128xf32>
    %cst_38 = arith.constant 0.000000e+00 : f32
    %109 = vector.broadcast %cst_38 : f32 to vector<1x128xf32>
    %110 = arith.cmpf ogt, %108, %109 : vector<1x128xf32>
    %111 = arith.extui %110 : vector<1x128xi1> to vector<1x128xi32>
    %112 = arith.sitofp %111 : vector<1x128xi32> to vector<1x128xf32>
    %c0_39 = arith.constant 0 : index
    %c0_40 = arith.constant 0 : index
    %113 = vector.load %arg5[%c0_39, %c0_40] : memref<1x128xf32, #tpu.memory_space<vmem>>, vector<1x128xf32>
    tpu.vector_store %arg5[%c0_39, %c0_40], %44 {strides = array<i32>} : memref<1x128xf32, #tpu.memory_space<vmem>>, vector<1x128xf32>,
    %c0_41 = arith.constant 0 : index
    %c0_42 = arith.constant 0 : index
    %114 = vector.load %arg6[%c0_41, %c0_42] : memref<8x128xf32, #tpu.memory_space<vmem>>, vector<8x128xf32>
    tpu.vector_store %arg6[%c0_41, %c0_42], %49 {strides = array<i32>} : memref<8x128xf32, #tpu.memory_space<vmem>>, vector<8x128xf32>,
    %c0_43 = arith.constant 0 : index
    %c0_44 = arith.constant 0 : index
    %115 = vector.load %arg7[%c0_43, %c0_44] : memref<8x128xf32, #tpu.memory_space<vmem>>, vector<8x128xf32>
    tpu.vector_store %arg7[%c0_43, %c0_44], %50 {strides = array<i32>} : memref<8x128xf32, #tpu.memory_space<vmem>>, vector<8x128xf32>,
    %c0_45 = arith.constant 0 : index
    %c0_46 = arith.constant 0 : index
    %116 = vector.load %arg8[%c0_45, %c0_46] : memref<1x128xf32, #tpu.memory_space<vmem>>, vector<1x128xf32>
    tpu.vector_store %arg8[%c0_45, %c0_46], %80 {strides = array<i32>} : memref<1x128xf32, #tpu.memory_space<vmem>>, vector<1x128xf32>,
    %c0_47 = arith.constant 0 : index
    %c0_48 = arith.constant 0 : index
    %117 = vector.load %arg9[%c0_47, %c0_48] : memref<1x128xf32, #tpu.memory_space<vmem>>, vector<1x128xf32>
    tpu.vector_store %arg9[%c0_47, %c0_48], %106 {strides = array<i32>} : memref<1x128xf32, #tpu.memory_space<vmem>>, vector<1x128xf32>,
    %c0_49 = arith.constant 0 : index
    %c0_50 = arith.constant 0 : index
    %118 = vector.load %arg10[%c0_49, %c0_50] : memref<1x128xf32, #tpu.memory_space<vmem>>, vector<1x128xf32>
    tpu.vector_store %arg10[%c0_49, %c0_50], %112 {strides = array<i32>} : memref<1x128xf32, #tpu.memory_space<vmem>>, vector<1x128xf32>,
    return
  }
  func.func @transform_0(%arg0: i32) -> (i32, i32) {
    %c0_i32 = arith.constant 0 : i32
    %c0_i32_0 = arith.constant 0 : i32
    %c0_i32_1 = arith.constant 0 : i32
    return %c0_i32, %c0_i32_0 : i32, i32
  }
  func.func @transform_1(%arg0: i32) -> (i32, i32) {
    %c0_i32 = arith.constant 0 : i32
    %c0_i32_0 = arith.constant 0 : i32
    return %arg0, %c0_i32 : i32, i32
  }
  func.func @transform_2(%arg0: i32) -> (i32, i32) {
    %c0_i32 = arith.constant 0 : i32
    %c0_i32_0 = arith.constant 0 : i32
    return %arg0, %c0_i32 : i32, i32
  }
  func.func @transform_3(%arg0: i32) -> (i32, i32) {
    %c0_i32 = arith.constant 0 : i32
    %c0_i32_0 = arith.constant 0 : i32
    return %c0_i32, %arg0 : i32, i32
  }
  func.func @transform_4(%arg0: i32) -> (i32, i32) {
    %c0_i32 = arith.constant 0 : i32
    %c0_i32_0 = arith.constant 0 : i32
    return %c0_i32, %arg0 : i32, i32
  }
  func.func @transform_5(%arg0: i32) -> (i32, i32) {
    %c0_i32 = arith.constant 0 : i32
    %c0_i32_0 = arith.constant 0 : i32
    return %c0_i32, %arg0 : i32, i32
  }
  func.func @transform_6(%arg0: i32) -> (i32, i32) {
    %c0_i32 = arith.constant 0 : i32
    %c0_i32_0 = arith.constant 0 : i32
    return %c0_i32, %arg0 : i32, i32
  }
  func.func @transform_7(%arg0: i32) -> (i32, i32) {
    %c0_i32 = arith.constant 0 : i32
    %c0_i32_0 = arith.constant 0 : i32
    return %c0_i32, %arg0 : i32, i32
  }
  func.func @transform_8(%arg0: i32) -> (i32, i32) {
    %c0_i32 = arith.constant 0 : i32
    %c0_i32_0 = arith.constant 0 : i32
    return %c0_i32, %arg0 : i32, i32
  }
  func.func @transform_9(%arg0: i32) -> (i32, i32) {
    %c0_i32 = arith.constant 0 : i32
    %c0_i32_0 = arith.constant 0 : i32
    return %c0_i32, %arg0 : i32, i32
  }
}

</mosaic_0001>

<bundles_post_ra>
// kernel: tpu_custom_call.1
= control target key start
LH: loop header
LB: loop body
LE: loop exit
PB: predicated region body
PF: predicated region fallthrough
CT: control target
= control target key end

     0   :  { %15 = vsyncpa [#allocation3], 0  ;;  %s2349_s0 = inlined_call_operand.vmem [shape: f32[8,32], index: 0, kind: input, shape index: {}]   ;;  %s2350_s1 = inlined_call_operand.vmem [shape: f32[128,32], index: 1, kind: input, shape index: {}]   ;;  %s2351_s2 = inlined_call_operand.vmem [shape: f32[128,32], index: 2, kind: input, shape index: {}]   ;;  %s2352_s3 = inlined_call_operand.vmem [shape: f32[8,128], index: 3, kind: input, shape index: {}]   ;;  %s2353_s4 = inlined_call_operand.hbm [shape: f32[1,128], index: 4, kind: output, shape index: {0}]   ;;  %s2354_s5 = inlined_call_operand.hbm [shape: f32[8,128], index: 5, kind: output, shape index: {1}]   ;;  %s2355_s6 = inlined_call_operand.hbm [shape: f32[8,128], index: 6, kind: output, shape index: {2}]   ;;  %s2356_s7 = inlined_call_operand.hbm [shape: f32[1,128], index: 7, kind: output, shape index: {3}]   ;;  %s2357_s8 = inlined_call_operand.hbm [shape: f32[1,128], index: 8, kind: output, shape index: {4}]   ;;  %s2358_s9 = inlined_call_operand.hbm [shape: f32[1,128], index: 9, kind: output, shape index: {5}]  }
   0x1   :  { %16 = vsyncpa [#allocation5], 0 }
   0x2   :  { %17 = vsyncpa [#allocation8], 0  ;;  %v1365_v0 = vld [vmem:[%s2350_s1 + $0x78] sm:$0xff]  ;;  %vm62_vm0 = vcmask 261120   ;;  %v1370_v1 = vld [vmem:[%s2350_s1 + $0x70] sm:$0xff] }
   0x3   :  { %v1375_v2 = vld [vmem:[%s2350_s1 + $0x68] sm:$0xff]  ;;  %v93_v3 = vmul.f32 %v1365_v0, %v1365_v0  ;;  %v92_v4 = vmul.f32 %v1370_v1, %v1370_v1  ;;  %v1386_v6 = vld [vmem:[%s2351_s2 + $0x78] sm:$0xff]  ;;  %v1391_v7 = vld [vmem:[%s2351_s2 + $0x70] sm:$0xff] }
   0x4   :  { %v91_v5 = vmul.f32 %v1375_v2, %v1375_v2  ;;  %v1399_v11 = vld [vmem:[%s2351_s2 + $0x68] sm:$0xff]  ;;  %v349_v12 = vmul.f32 %v1386_v6, %v1386_v6  ;;  %v348_v13 = vmul.f32 %v1391_v7, %v1391_v7 }
   0x5   :  { %v139_v8 = vsel %vm62_vm0, %v93_v3, 0.0  ;;  %v136_v9 = vsel %vm62_vm0, %v92_v4, 0.0 }
   0x6   :  { %v133_v10 = vsel %vm62_vm0, %v91_v5, 0.0  ;;  %140 = vadd.xlane.f32.xlu0 %v139_v8  ;;  %137 = vadd.xlane.f32.xlu1 %v136_v9 }
   0x7   :  { %134 = vadd.xlane.f32.xlu2 %v133_v10 }
   0x8   :  { %18 = vsyncpa [#allocation11], 0  ;;  %v347_v14 = vmul.f32 %v1399_v11, %v1399_v11  ;;  %v395_v15 = vsel %vm62_vm0, %v349_v12, 0.0  ;;  %v392_v16 = vsel %vm62_vm0, %v348_v13, 0.0  ;;  %v1413_v18 = vld [vmem:[%s2351_s2 + $0x60] sm:$0xff]  ;;  %v1423_v20 = vld [vmem:[%s2350_s1 + $0x58] sm:$0xff] }
   0x9   :  { %v1418_v19 = vld [vmem:[%s2350_s1 + $0x60] sm:$0xff]  ;;  %v346_v21 = vmul.f32 %v1413_v18, %v1413_v18  ;;  %v89_v23 = vmul.f32 %v1423_v20, %v1423_v20  ;;  %v1437_v27 = vld [vmem:[%s2351_s2 + $0x58] sm:$0xff]  ;;  %v1442_v28 = vld [vmem:[%s2350_s1 + $0x50] sm:$0xff]  ;;  %s913_s10 = sshll.u32 %s2353_s4, 4  ;;  %s924_s14 = sshll.u32 %s2354_s5, 4  ;;  %s914_s10 = int_to_ptr.hbm [resolvable:$true] %s913_s10  ;;  %s925_s14 = int_to_ptr.hbm [resolvable:$true] %s924_s14 }
   0xa   :  { %v389_v17 = vsel %vm62_vm0, %v347_v14, 0.0  ;;  %v90_v22 = vmul.f32 %v1418_v19, %v1418_v19  ;;  %v1447_v29 = vld [vmem:[%s2351_s2 + $0x50] sm:$0xff]  ;;  %v345_v30 = vmul.f32 %v1437_v27, %v1437_v27  ;;  %v88_v31 = vmul.f32 %v1442_v28, %v1442_v28  ;;  %v1461_v36 = vld [vmem:[%s2351_s2 + $0x48] sm:$0xff]  ;;  %v1471_v38 = vld [vmem:[%s2350_s1 + $0x40] sm:$0xff]  ;;  %s1308_s4 = smov [#allocation6]   ;;  %s935_s18 = sshll.u32 %s2355_s6, 4  ;;  %s936_s18 = int_to_ptr.hbm [resolvable:$true] %s935_s18 }
   0xb   :  { %v386_v24 = vsel %vm62_vm0, %v346_v21, 0.0  ;;  %v127_v26 = vsel %vm62_vm0, %v89_v23, 0.0  ;;  %v344_v32 = vmul.f32 %v1447_v29, %v1447_v29  ;;  %v1466_v37 = vld [vmem:[%s2350_s1 + $0x48] sm:$0xff]  ;;  %v343_v39 = vmul.f32 %v1461_v36, %v1461_v36  ;;  %v1485_v45 = vld [vmem:[%s2351_s2 + $0x40] sm:$0xff]  ;;  %v1490_v46 = vld [vmem:[%s2350_s1 + $0x38] sm:$0xff]  ;;  %s933_s15 = sshll.u32 %s1308_s4, 4  ;;  %s934_s15 = int_to_ptr.vmem [resolvable:$true] %s933_s15 }
   0xc   :  { %v130_v25 = vsel %vm62_vm0, %v90_v22, 0.0  ;;  %v383_v33 = vsel %vm62_vm0, %v345_v30, 0.0  ;;  %v124_v34 = vsel %vm62_vm0, %v88_v31, 0.0  ;;  %v87_v40 = vmul.f32 %v1466_v37, %v1466_v37  ;;  %v1495_v47 = vld [vmem:[%s2351_s2 + $0x38] sm:$0xff]  ;;  %v1509_v54 = vld [vmem:[%s2351_s2 + $0x30] sm:$0xff]  ;;  %v1519_v56 = vld [vmem:[%s2350_s1 + $0x28] sm:$0xff] }
   0xd   :  { %v380_v35 = vsel %vm62_vm0, %v344_v32, 0.0  ;;  %v86_v41 = vmul.f32 %v1471_v38, %v1471_v38  ;;  %v377_v42 = vsel %vm62_vm0, %v343_v39, 0.0  ;;  %v342_v48 = vmul.f32 %v1485_v45, %v1485_v45  ;;  %v1514_v55 = vld [vmem:[%s2350_s1 + $0x30] sm:$0xff]  ;;  %v1533_v63 = vld [vmem:[%s2351_s2 + $0x28] sm:$0xff]  ;;  %v1538_v3 = vld [vmem:[%s2350_s1 + $0x20] sm:$0xff]  ;;  %s1309_s5 = smov [#allocation10]  }
   0xe   :  { %396 = vadd.xlane.f32.xlu0 %v395_v15  ;;  %393 = vadd.xlane.f32.xlu1 %v392_v16  ;;  %v121_v43 = vsel %vm62_vm0, %v87_v40, 0.0  ;;  %v85_v49 = vmul.f32 %v1490_v46, %v1490_v46  ;;  %v341_v50 = vmul.f32 %v1495_v47, %v1495_v47  ;;  %v340_v57 = vmul.f32 %v1509_v54, %v1509_v54  ;;  %v1543_v4 = vld [vmem:[%s2351_s2 + $0x20] sm:$0xff]  ;;  %v47_v14 = vld [vmem:[%s2351_s2 + $0x18] sm:$0xff]  ;;  %v30_v16 = vld [vmem:[%s2350_s1 + $0x10] sm:$0xff]  ;;  %s966_s6 = sshll.u32 %s1309_s5, 4  ;;  %s968_s21 = sshll.u32 %s2358_s9, 4  ;;  %s967_s6 = int_to_ptr.vmem [resolvable:$true] %s966_s6  ;;  %s969_s21 = int_to_ptr.hbm [resolvable:$true] %s968_s21 }
   0xf   :  { %390 = vadd.xlane.f32.xlu2 %v389_v17  ;;  %v118_v44 = vsel %vm62_vm0, %v86_v41, 0.0  ;;  %v374_v51 = vsel %vm62_vm0, %v342_v48, 0.0  ;;  %v84_v58 = vmul.f32 %v1514_v55, %v1514_v55  ;;  %v83_v59 = vmul.f32 %v1519_v56, %v1519_v56  ;;  %v1560_v15 = vld [vmem:[%s2350_s1 + $0x18] sm:$0xff]  ;;  %v29_v30 = vld [vmem:[%s2350_s1 + $0x8] sm:$0xff]  ;;  %v44_v41 = vld [vmem:[%s2351_s2] sm:$0xff]  ;;  %s1310_s9 = smov [#allocation7]  }
  0x10   :  { %v115_v52 = vsel %vm62_vm0, %v85_v49, 0.0  ;;  %v371_v53 = vsel %vm62_vm0, %v341_v50, 0.0  ;;  %v368_v60 = vsel %vm62_vm0, %v340_v57, 0.0  ;;  %v339_v5 = vmul.f32 %v1533_v63, %v1533_v63  ;;  %v45_v31 = vld [vmem:[%s2351_s2 + $0x8] sm:$0xff]  ;;  %s944_s22 = sshll.u32 %s1310_s9, 4  ;;  %s946_s25 = sshll.u32 %s2356_s7, 4  ;;  %s945_s22 = int_to_ptr.vmem [resolvable:$true] %s944_s22  ;;  %s947_s25 = int_to_ptr.hbm [resolvable:$true] %s946_s25 }
  0x11   :  { %v112_v61 = vsel %vm62_vm0, %v84_v58, 0.0  ;;  %v109_v62 = vsel %vm62_vm0, %v83_v59, 0.0  ;;  %v82_v8 = vmul.f32 %v1538_v3, %v1538_v3  ;;  %v338_v9 = vmul.f32 %v1543_v4, %v1543_v4  ;;  %s1311_s26 = smov [#allocation9]  }
  0x12   :  { %v365_v10 = vsel %vm62_vm0, %v339_v5, 0.0  ;;  %v337_v17 = vmul.f32 %v47_v14, %v47_v14  ;;  %v81_v21 = vmul.f32 %v1560_v15, %v1560_v15  ;;  %v80_v22 = vmul.f32 %v30_v16, %v30_v16  ;;  %s955_s27 = sshll.u32 %s1311_s26, 4  ;;  %s956_s27 = int_to_ptr.vmem [resolvable:$true] %s955_s27 }
  0x13   :  { %v106_v12 = vsel %vm62_vm0, %v82_v8, 0.0  ;;  %v362_v13 = vsel %vm62_vm0, %v338_v9, 0.0 }
  0x14   :  { %v359_v23 = vsel %vm62_vm0, %v337_v17, 0.0 }
  0x16   :  { %387 = vadd.xlane.f32.xlu1 %v386_v24  ;;  %131 = vadd.xlane.f32.xlu0 %v130_v25  ;;  %v103_v24 = vsel %vm62_vm0, %v81_v21, 0.0  ;;  %v100_v25 = vsel %vm62_vm0, %v80_v22, 0.0 }
  0x17   :  { %128 = vadd.xlane.f32.xlu2 %v127_v26  ;;  %v46_v26 = vld [vmem:[%s2351_s2 + $0x10] sm:$0xff] }
  0x18   :  { %v336_v32 = vmul.f32 %v46_v26, %v46_v26 }
  0x1e   :  { %384 = vadd.xlane.f32.xlu0 %v383_v33  ;;  %125 = vadd.xlane.f32.xlu1 %v124_v34  ;;  %v79_v33 = vmul.f32 %v29_v30, %v29_v30  ;;  %v335_v34 = vmul.f32 %v45_v31, %v45_v31 }
  0x1f   :  { %381 = vadd.xlane.f32.xlu2 %v380_v35  ;;  %v356_v35 = vsel %vm62_vm0, %v336_v32, 0.0 }
  0x20   :  { %v97_v39 = vsel %vm62_vm0, %v79_v33, 0.0  ;;  %v353_v40 = vsel %vm62_vm0, %v335_v34, 0.0 }
  0x26   :  { %378 = vadd.xlane.f32.xlu1 %v377_v42  ;;  %122 = vadd.xlane.f32.xlu0 %v121_v43  ;;  %v28_v42 = vld [vmem:[%s2350_s1] sm:$0xff] }
  0x27   :  { %119 = vadd.xlane.f32.xlu2 %v118_v44  ;;  %v27_v43 = vld [vmem:[%s2349_s0] sm:$0xff]  ;;  %v334_v44 = vmul.f32 %v44_v41, %v44_v41  ;;  %v78_v48 = vmul.f32 %v28_v42, %v28_v42 }
  0x28   :  { %v61_v49 = vmul.f32 %v27_v43, %v27_v43 }
  0x29   :  { %v350_v50 = vsel %vm62_vm0, %v334_v44, 0.0 }
  0x2e   :  { %375 = vadd.xlane.f32.xlu0 %v374_v51  ;;  %116 = vadd.xlane.f32.xlu1 %v115_v52  ;;  %v94_v51 = vsel %vm62_vm0, %v78_v48, 0.0  ;;  %v63_v52 = vsel %vm62_vm0, %v61_v49, 0.0 }
  0x2f   :  { %372 = vadd.xlane.f32.xlu2 %v371_v53 }
  0x36   :  { %369 = vadd.xlane.f32.xlu1 %v368_v60  ;;  %113 = vadd.xlane.f32.xlu0 %v112_v61 }
  0x37   :  { %110 = vadd.xlane.f32.xlu2 %v109_v62 }
  0x3e   :  { %366 = vadd.xlane.f32.xlu0 %v365_v10  ;;  %107 = vadd.xlane.f32.xlu1 %v106_v12 }
  0x3f   :  { %363 = vadd.xlane.f32.xlu2 %v362_v13 }
  0x46   :  { %360 = vadd.xlane.f32.xlu1 %v359_v23  ;;  %104 = vadd.xlane.f32.xlu0 %v103_v24 }
  0x47   :  { %101 = vadd.xlane.f32.xlu2 %v100_v25 }
  0x4e   :  { %357 = vadd.xlane.f32.xlu0 %v356_v35  ;;  %98 = vadd.xlane.f32.xlu1 %v97_v39 }
  0x4f   :  { %354 = vadd.xlane.f32.xlu2 %v353_v40 }
  0x56   :  { %351 = vadd.xlane.f32.xlu1 %v350_v50  ;;  %95 = vadd.xlane.f32.xlu0 %v94_v51 }
  0x57   :  { %64 = vadd.xlane.f32.xlu2 %v63_v52 }
  0x79   :  { %v141_v53 = vpop.xlane.xlu0 %140  ;;  %v138_v57 = vpop.xlane.xlu1 %137 }
  0x7a   :  { %v157_v58 = vadd.f32 1e-12, %v141_v53  ;;  %v156_v59 = vadd.f32 1e-12, %v138_v57  ;;  %v135_v60 = vpop.xlane.xlu2 %134 }
  0x7b   :  { %v1594_v61 = vadd.f32 1e-12, %v135_v60 }
  0x7c   :  { %1066 = vrsqrt.f32 %v157_v58  ;;  %vm314_vm2 = vweird.f32 %v157_v58  ;;  %vm304_vm4 = vweird.f32 %v156_v59 }
  0x7d   :  { %1068 = vrsqrt.f32 %v156_v59  ;;  %vm294_vm8 = vweird.f32 %v1594_v61 }
  0x7e   :  { %1070 = vrsqrt.f32 %v1594_v61 }
  0x81   :  { %v397_v62 = vpop.xlane.xlu0 %396  ;;  %v394_v5 = vpop.xlane.xlu1 %393 }
  0x82   :  { %v1067_v8 = vpop.eup %1066  ;;  %v1597_v9 = vadd.f32 1e-12, %v397_v62  ;;  %v1599_v10 = vadd.f32 1e-12, %v394_v5  ;;  %v391_v12 = vpop.xlane.xlu2 %390 }
  0x83   :  { %v1601_v13 = vpop.eup %1068  ;;  %v309_v14 = vmul.f32 %v1067_v8, %v157_v58  ;;  %v1603_v16 = vadd.f32 1e-12, %v391_v12  ;;  %vm315_vm1 = vweird.f32 %v1067_v8 }
  0x84   :  { %v1605_v17 = vpop.eup %1070  ;;  %v299_v21 = vmul.f32 %v1601_v13, %v156_v59  ;;  %1072 = vrsqrt.f32 %v1597_v9  ;;  %vm305_vm3 = vweird.f32 %v1601_v13  ;;  %vm316_vm5 = vmor %vm314_vm2, %vm315_vm1  ;;  %vm570_vm11 = vweird.f32 %v1597_v9 }
  0x85   :  { %v310_v22 = vmul.f32 %v1067_v8, %v309_v14  ;;  %v289_v23 = vmul.f32 %v1605_v17, %v1594_v61  ;;  %1074 = vrsqrt.f32 %v1599_v10  ;;  %vm1641_vm6 = vmor %vm304_vm4, %vm305_vm3  ;;  %vm295_vm7 = vweird.f32 %v1605_v17 }
  0x86   :  { %v300_v24 = vmul.f32 %v1601_v13, %v299_v21  ;;  %1076 = vrsqrt.f32 %v1603_v16  ;;  %vm296_vm10 = vmor %vm294_vm8, %vm295_vm7  ;;  %vm560_vm12 = vweird.f32 %v1599_v10  ;;  %vm550_vm15 = vweird.f32 %v1603_v16 }
  0x87   :  { %v311_v25 = vmul.f32 0.5, %v310_v22  ;;  %v290_v26 = vmul.f32 %v1605_v17, %v289_v23 }
  0x88   :  { %v301_v30 = vmul.f32 0.5, %v300_v24 }
  0x89   :  { %v312_v31 = vsub.f32 1.5, %v311_v25  ;;  %v388_v32 = vpop.xlane.xlu1 %387  ;;  %v132_v33 = vpop.xlane.xlu0 %131  ;;  %v291_v35 = vmul.f32 0.5, %v290_v26 }
  0x8a   :  { %v1615_v34 = vpop.eup %1072  ;;  %v1617_v39 = vadd.f32 1e-12, %v388_v32  ;;  %v1619_v40 = vadd.f32 1e-12, %v132_v33  ;;  %v129_v41 = vpop.xlane.xlu2 %128  ;;  %v302_v43 = vsub.f32 1.5, %v301_v30 }
  0x8b   :  { %v1621_v42 = vpop.eup %1074  ;;  %v565_v44 = vmul.f32 %v1615_v34, %v1597_v9  ;;  %v1625_v48 = vadd.f32 1e-12, %v129_v41  ;;  %v313_v49 = vmul.f32 %v1067_v8, %v312_v31  ;;  %v292_v57 = vsub.f32 1.5, %v291_v35 }
  0x8c   :  { %v1627_v50 = vpop.eup %1076  ;;  %v555_v51 = vmul.f32 %v1621_v42, %v1599_v10  ;;  %1078 = vrsqrt.f32 %v1617_v39  ;;  %v303_v5 = vmul.f32 %v1601_v13, %v302_v43  ;;  %vm571_vm9 = vweird.f32 %v1615_v34 }
  0x8d   :  { %v566_v52 = vmul.f32 %v1615_v34, %v565_v44  ;;  %v545_v53 = vmul.f32 %v1627_v50, %v1603_v16  ;;  %1080 = vrsqrt.f32 %v1619_v40  ;;  %v317_v62 = vsel %vm316_vm5, %v1067_v8, %v313_v49  ;;  %vm572_vm13 = vmor %vm570_vm11, %vm571_vm9 }
  0x8e   :  { %1082 = vrsqrt.f32 %v1625_v48  ;;  %v556_v60 = vmul.f32 %v1621_v42, %v555_v51  ;;  %v1647_v21 = vmul.f32 %v317_v62, %v1365_v0  ;;  %v307_v23 = vsel %vm1641_vm6, %v1601_v13, %v303_v5 }
  0x8f   :  { %v567_v58 = vmul.f32 0.5, %v566_v52  ;;  %v546_v14 = vmul.f32 %v1627_v50, %v545_v53  ;;  %v293_v13 = vmul.f32 %v1605_v17, %v292_v57  ;;  %v1672_v43 = vmul.f32 %v307_v23, %v1370_v1 }
  0x90   :  { %1000 = vmatpush.xpose.msk.msra.mxu0 %vm62_vm0, %v1647_v21  ;;  %v557_v31 = vmul.f32 0.5, %v556_v60  ;;  %vm561_vm14 = vweird.f32 %v1621_v42  ;;  %vm551_vm1 = vweird.f32 %v1627_v50  ;;  %vm284_vm2 = vweird.f32 %v1619_v40 }
  0x91   :  { %v385_v59 = vpop.xlane.xlu0 %384  ;;  %v126_v22 = vpop.xlane.xlu1 %125  ;;  %v568_v30 = vsub.f32 1.5, %v567_v58  ;;  %v547_v35 = vmul.f32 0.5, %v546_v14  ;;  %v297_v51 = vsel %vm296_vm10, %v1605_v17, %v293_v13  ;;  %vm274_vm3 = vweird.f32 %v1625_v48  ;;  %vm562_vm4 = vmor %vm560_vm12, %vm561_vm14 }
  0x92   :  { %v1652_v24 = vpop.eup %1078  ;;  %v1657_v8 = vadd.f32 1e-12, %v385_v59  ;;  %v382_v25 = vpop.xlane.xlu2 %381  ;;  %v1659_v26 = vadd.f32 1e-12, %v126_v22  ;;  %v558_v1 = vsub.f32 1.5, %v557_v31  ;;  %v1693_v58 = vmul.f32 %v297_v51, %v1375_v2  ;;  %vm1741_vm6 = vmor %vm550_vm15, %vm551_vm1 }
  0x93   :  { %v1661_v0 = vpop.eup %1080  ;;  %v1663_v32 = vadd.f32 1e-12, %v382_v25  ;;  %v569_v52 = vmul.f32 %v1615_v34, %v568_v30  ;;  %v548_v53 = vsub.f32 1.5, %v547_v35  ;;  %v535_v9 = vmul.f32 %v1652_v24, %v1617_v39 }
  0x94   :  { %v1666_v33 = vpop.eup %1082  ;;  %v279_v41 = vmul.f32 %v1661_v0, %v1619_v40  ;;  %1084 = vrsqrt.f32 %v1657_v8  ;;  %1001 = vmatpush.xpose.msk.msra.mxu0 %vm62_vm0, %v1672_v43  ;;  %v559_v30 = vmul.f32 %v1621_v42, %v558_v1  ;;  %vm285_vm5 = vweird.f32 %v1661_v0 }
  0x95   :  { %v269_v44 = vmul.f32 %v1666_v33, %v1625_v48  ;;  %1086 = vrsqrt.f32 %v1663_v32  ;;  %v573_v17 = vsel %vm572_vm13, %v1615_v34, %v569_v52  ;;  %v549_v35 = vmul.f32 %v1627_v50, %v548_v53  ;;  %vm1757_vm9 = vmor %vm284_vm2, %vm285_vm5 }
  0x96   :  { %v280_v49 = vmul.f32 %v1661_v0, %v279_v41  ;;  %1088 = vrsqrt.f32 %v1659_v26  ;;  %v589_v2 = vmul.f32 %v573_v17, %v1386_v6  ;;  %v536_v6 = vmul.f32 %v1652_v24, %v535_v9 }
  0x97   :  { %v270_v61 = vmul.f32 %v1666_v33, %v269_v44  ;;  %vm541_vm7 = vweird.f32 %v1652_v24  ;;  %v563_v52 = vsel %vm562_vm4, %v1621_v42, %v559_v30  ;;  %vm540_vm8 = vweird.f32 %v1617_v39 }
  0x98   :  { %v281_v57 = vmul.f32 0.5, %v280_v49  ;;  %1002 = vmatpush.xpose.msk.msra.mxu0 %vm62_vm0, %v1693_v58  ;;  %1018 = vmatpush.xpose.msk.msra.mxu1 %vm62_vm0, %v589_v2  ;;  %v748_v51 = vmul.f32 %v589_v2, %v1647_v21  ;;  %v537_v53 = vmul.f32 0.5, %v536_v6  ;;  %v588_v9 = vmul.f32 %v563_v52, %v1391_v7 }
  0x99   :  { %v379_v60 = vpop.xlane.xlu1 %378  ;;  %v123_v62 = vpop.xlane.xlu0 %122  ;;  %v271_v12 = vmul.f32 0.5, %v270_v61  ;;  %v553_v16 = vsel %vm1741_vm6, %v1627_v50, %v549_v35  ;;  %vm275_vm10 = vweird.f32 %v1666_v33  ;;  %vm530_vm11 = vweird.f32 %v1657_v8 }
  0x9a   :  { %v1701_v5 = vpop.eup %1084  ;;  %v1706_v14 = vadd.f32 1e-12, %v379_v60  ;;  %v1708_v59 = vadd.f32 1e-12, %v123_v62  ;;  %v120_v22 = vpop.xlane.xlu2 %119  ;;  %v282_v13 = vsub.f32 1.5, %v281_v57  ;;  %1036 = vmatpush.xpose.msk.msra.mxu2 %vm62_vm0, %v748_v51  ;;  %v747_v6 = vmul.f32 %v588_v9, %v1672_v43  ;;  %vm1791_vm13 = vmor %vm274_vm3, %vm275_vm10 }
  0x9b   :  { %v1710_v23 = vpop.eup %1086  ;;  %v525_v34 = vmul.f32 %v1701_v5, %v1657_v8  ;;  %v1715_v25 = vadd.f32 1e-12, %v120_v22  ;;  %v272_v49 = vsub.f32 1.5, %v271_v12  ;;  %v587_v35 = vmul.f32 %v553_v16, %v1399_v11  ;;  %vm1821_vm3 = vmor %vm540_vm8, %vm541_vm7 }
  0x9c   :  { %v1718_v31 = vpop.eup %1088  ;;  %1090 = vrsqrt.f32 %v1706_v14  ;;  %v515_v1 = vmul.f32 %v1710_v23, %v1663_v32  ;;  %v283_v57 = vmul.f32 %v1661_v0, %v282_v13  ;;  %1019 = vmatpush.xpose.msk.msra.mxu1 %vm62_vm0, %v588_v9  ;;  %vm264_vm12 = vweird.f32 %v1659_v26 }
  0x9d   :  { %v526_v41 = vmul.f32 %v1701_v5, %v525_v34  ;;  %v259_v44 = vmul.f32 %v1718_v31, %v1659_v26  ;;  %1092 = vrsqrt.f32 %v1708_v59  ;;  %v273_v22 = vmul.f32 %v1666_v33, %v272_v49 }
  0x9e   :  { %1094 = vrsqrt.f32 %v1715_v25  ;;  %v516_v50 = vmul.f32 %v1710_v23, %v515_v1  ;;  %v287_v40 = vsel %vm1757_vm9, %v1661_v0, %v283_v57  ;;  %1037 = vmatpush.xpose.msk.msra.mxu2 %vm62_vm0, %v747_v6  ;;  %vm531_vm14 = vweird.f32 %v1701_v5 }
  0x9f   :  { %v260_v10 = vmul.f32 %v1718_v31, %v259_v44  ;;  %v527_v42 = vmul.f32 0.5, %v526_v41  ;;  %v330_v13 = vmul.f32 %v287_v40, %v1418_v19  ;;  %v538_v44 = vsub.f32 1.5, %v537_v53  ;;  %vm1834_vm4 = vmor %vm530_vm11, %vm531_vm14 }
  0xa0   :  { %1020 = vmatpush.xpose.msk.msra.mxu1 %vm62_vm0, %v587_v35  ;;  %v277_v51 = vsel %vm1791_vm13, %v1666_v33, %v273_v22  ;;  %v517_v52 = vmul.f32 0.5, %v516_v50  ;;  %v746_v53 = vmul.f32 %v587_v35, %v1693_v58  ;;  %vm520_vm15 = vweird.f32 %v1663_v32 }
  0xa1   :  { %v261_v21 = vmul.f32 0.5, %v260_v10  ;;  %v376_v7 = vpop.xlane.xlu0 %375  ;;  %v117_v60 = vpop.xlane.xlu1 %116  ;;  %v528_v19 = vsub.f32 1.5, %v527_v42  ;;  %1003 = vmatpush.xpose.msk.msra.mxu0 %vm62_vm0, %v330_v13  ;;  %vm521_vm1 = vweird.f32 %v1710_v23  ;;  %vm265_vm2 = vweird.f32 %v1718_v31 }
  0xa2   :  { %v1764_v62 = vpop.eup %1090  ;;  %v1771_v12 = vadd.f32 1e-12, %v376_v7  ;;  %v373_v2 = vpop.xlane.xlu2 %372  ;;  %v1804_v48 = vadd.f32 1e-12, %v117_v60  ;;  %v329_v9 = vmul.f32 %v277_v51, %v1423_v20  ;;  %1038 = vmatpush.xpose.msk.msra.mxu2 %vm62_vm0, %v746_v53  ;;  %v539_v16 = vmul.f32 %v1652_v24, %v538_v44  ;;  %vm266_vm5 = vmor %vm264_vm12, %vm265_vm2 }
  0xa3   :  { %v1774_v34 = vpop.eup %1092  ;;  %v505_v30 = vmul.f32 %v1764_v62, %v1706_v14  ;;  %v262_v11 = vsub.f32 1.5, %v261_v21  ;;  %v1798_v1 = vadd.f32 1e-12, %v373_v2  ;;  %v529_v60 = vmul.f32 %v1701_v5, %v528_v19  ;;  %vm1887_vm11 = vmor %vm520_vm15, %vm521_vm1 }
  0xa4   :  { %v1781_v41 = vpop.eup %1094  ;;  %v249_v0 = vmul.f32 %v1774_v34, %v1708_v59  ;;  %1096 = vrsqrt.f32 %v1771_v12  ;;  %v518_v22 = vsub.f32 1.5, %v517_v52  ;;  %vm510_vm6 = vweird.f32 %v1706_v14 }
  0xa5   :  { %v506_v49 = vmul.f32 %v1764_v62, %v505_v30  ;;  %v239_v10 = vmul.f32 %v1781_v41, %v1715_v25  ;;  %1098 = vrsqrt.f32 %v1798_v1  ;;  %v263_v17 = vmul.f32 %v1718_v31, %v262_v11  ;;  %1004 = vmatpush.xpose.msk.msra.mxu0 %vm62_vm0, %v329_v9 }
  0xa6   :  { %v250_v61 = vmul.f32 %v1774_v34, %v249_v0  ;;  %1100 = vrsqrt.f32 %v1804_v48  ;;  %v543_v30 = vsel %vm1821_vm3, %v1652_v24, %v539_v16  ;;  %v533_v44 = vsel %vm1834_vm4, %v1701_v5, %v529_v60 }
  0xa7   :  { %v507_v57 = vmul.f32 0.5, %v506_v49  ;;  %v240_v39 = vmul.f32 %v1781_v41, %v239_v10  ;;  %v586_v6 = vmul.f32 %v543_v30, %v1413_v18  ;;  %v267_v35 = vsel %vm266_vm5, %v1718_v31, %v263_v17 }
  0xa8   :  { %v251_v58 = vmul.f32 0.5, %v250_v61  ;;  %v328_v19 = vmul.f32 %v267_v35, %v1442_v28  ;;  %v585_v11 = vmul.f32 %v533_v44, %v1437_v27  ;;  %vm511_vm7 = vweird.f32 %v1764_v62 }
  0xa9   :  { %v370_v42 = vpop.xlane.xlu1 %369  ;;  %v114_v21 = vpop.xlane.xlu0 %113  ;;  %v508_v0 = vsub.f32 1.5, %v507_v57  ;;  %v241_v24 = vmul.f32 0.5, %v240_v39  ;;  %1021 = vmatpush.xpose.msk.msra.mxu1 %vm62_vm0, %v586_v6  ;;  %v745_v31 = vmul.f32 %v586_v6, %v330_v13  ;;  %vm254_vm8 = vweird.f32 %v1708_v59  ;;  %vm1901_vm12 = vmor %vm510_vm6, %vm511_vm7 }
  0xaa   :  { %v1828_v7 = vpop.eup %1096  ;;  %v1841_v50 = vadd.f32 1e-12, %v370_v42  ;;  %v1843_v40 = vadd.f32 1e-12, %v114_v21  ;;  %v111_v2 = vpop.xlane.xlu2 %110  ;;  %v252_v43 = vsub.f32 1.5, %v251_v58  ;;  %1005 = vmatpush.xpose.msk.msra.mxu0 %vm62_vm0, %v328_v19  ;;  %vm255_vm9 = vweird.f32 %v1774_v34 }
  0xab   :  { %v495_v8 = vmul.f32 %v1828_v7, %v1771_v12  ;;  %v1861_v26 = vpop.eup %1098  ;;  %vm244_vm10 = vweird.f32 %v1715_v25  ;;  %1039 = vmatpush.xpose.msk.msra.mxu2 %vm62_vm0, %v745_v31  ;;  %v1880_v28 = vadd.f32 1e-12, %v111_v2  ;;  %v744_v13 = vmul.f32 %v585_v11, %v329_v9  ;;  %vm1915_vm14 = vmor %vm254_vm8, %vm255_vm9 }
  0xac   :  { %1102 = vrsqrt.f32 %v1841_v50  ;;  %v1865_v49 = vpop.eup %1100  ;;  %v485_v18 = vmul.f32 %v1861_v26, %v1798_v1  ;;  %v519_v61 = vmul.f32 %v1710_v23, %v518_v22  ;;  %v253_v53 = vmul.f32 %v1774_v34, %v252_v43 }
  0xad   :  { %1104 = vrsqrt.f32 %v1843_v40  ;;  %v496_v5 = vmul.f32 %v1828_v7, %v495_v8  ;;  %v229_v27 = vmul.f32 %v1865_v49, %v1804_v48  ;;  %v509_v33 = vmul.f32 %v1764_v62, %v508_v0  ;;  %1022 = vmatpush.xpose.msk.msra.mxu1 %vm62_vm0, %v585_v11 }
  0xae   :  { %v486_v51 = vmul.f32 %v1861_v26, %v485_v18  ;;  %v242_v16 = vsub.f32 1.5, %v241_v24  ;;  %vm245_vm13 = vweird.f32 %v1781_v41  ;;  %1106 = vrsqrt.f32 %v1880_v28 }
  0xaf   :  { %v230_v52 = vmul.f32 %v1865_v49, %v229_v27  ;;  %v523_v17 = vsel %vm1887_vm11, %v1710_v23, %v519_v61  ;;  %v497_v21 = vmul.f32 0.5, %v496_v5  ;;  %vm235_vm15 = vweird.f32 %v1865_v49  ;;  %1040 = vmatpush.xpose.msk.msra.mxu2 %vm62_vm0, %v744_v13  ;;  %vm1956_vm1 = vmor %vm244_vm10, %vm245_vm13 }
  0xb0   :  { %v584_v60 = vmul.f32 %v523_v17, %v1447_v29  ;;  %v257_v59 = vsel %vm1915_vm14, %v1774_v34, %v253_v53  ;;  %v513_v23 = vsel %vm1901_vm12, %v1764_v62, %v509_v33  ;;  %v487_v8 = vmul.f32 0.5, %v486_v51 }
  0xb1   :  { %v367_v57 = vpop.xlane.xlu0 %366  ;;  %v108_v9 = vpop.xlane.xlu1 %107  ;;  %v231_v20 = vmul.f32 0.5, %v230_v52  ;;  %v327_v44 = vmul.f32 %v257_v59, %v1466_v37  ;;  %v583_v34 = vmul.f32 %v513_v23, %v1461_v36  ;;  %v498_v0 = vsub.f32 1.5, %v497_v21 }
  0xb2   :  { %v1895_v58 = vpop.eup %1102  ;;  %v364_v42 = vpop.xlane.xlu2 %363  ;;  %v1932_v22 = vadd.f32 1e-12, %v367_v57  ;;  %1023 = vmatpush.xpose.msk.msra.mxu1 %vm62_vm0, %v584_v60  ;;  %v743_v35 = vmul.f32 %v584_v60, %v328_v19  ;;  %v1948_v18 = vadd.f32 1e-12, %v108_v9  ;;  %v243_v37 = vmul.f32 %v1781_v41, %v242_v16 }
  0xb3   :  { %v475_v39 = vmul.f32 %v1895_v58, %v1841_v50  ;;  %v1922_v2 = vpop.eup %1104  ;;  %v232_v30 = vsub.f32 1.5, %v231_v20  ;;  %v1942_v11 = vadd.f32 1e-12, %v364_v42  ;;  %1006 = vmatpush.xpose.msk.msra.mxu0 %vm62_vm0, %v327_v44  ;;  %v742_v19 = vmul.f32 %v583_v34, %v327_v44 }
  0xb4   :  { %v219_v6 = vmul.f32 %v1922_v2, %v1843_v40  ;;  %1108 = vrsqrt.f32 %v1932_v22  ;;  %v1944_v24 = vpop.eup %1106  ;;  %1041 = vmatpush.xpose.msk.msra.mxu2 %vm62_vm0, %v743_v35  ;;  %vm500_vm2 = vweird.f32 %v1771_v12  ;;  %vm501_vm3 = vweird.f32 %v1828_v7 }
  0xb5   :  { %v476_v29 = vmul.f32 %v1895_v58, %v475_v39  ;;  %v233_v36 = vmul.f32 %v1865_v49, %v232_v30  ;;  %vm234_vm4 = vweird.f32 %v1804_v48  ;;  %v488_v61 = vsub.f32 1.5, %v487_v8  ;;  %vm502_vm6 = vmor %vm500_vm2, %vm501_vm3 }
  0xb6   :  { %v220_v43 = vmul.f32 %v1922_v2, %v219_v6  ;;  %v209_v10 = vmul.f32 %v1944_v24, %v1880_v28  ;;  %1024 = vmatpush.xpose.msk.msra.mxu1 %vm62_vm0, %v583_v34  ;;  %1110 = vrsqrt.f32 %v1942_v11  ;;  %v247_v25 = vsel %vm1956_vm1, %v1781_v41, %v243_v37  ;;  %vm1972_vm5 = vmor %vm234_vm4, %vm235_vm15 }
  0xb7   :  { %v477_v62 = vmul.f32 0.5, %v476_v29  ;;  %1112 = vrsqrt.f32 %v1948_v18  ;;  %v326_v33 = vmul.f32 %v247_v25, %v1471_v38  ;;  %v237_v41 = vsel %vm1972_vm5, %v1865_v49, %v233_v36 }
  0xb8   :  { %v221_v5 = vmul.f32 0.5, %v220_v43  ;;  %1042 = vmatpush.xpose.msk.msra.mxu2 %vm62_vm0, %v742_v19  ;;  %v499_v9 = vmul.f32 %v1828_v7, %v498_v0  ;;  %vm490_vm7 = vweird.f32 %v1798_v1  ;;  %vm491_vm8 = vweird.f32 %v1861_v26 }
  0xb9   :  { %v361_v27 = vpop.xlane.xlu1 %360  ;;  %v105_v13 = vpop.xlane.xlu0 %104  ;;  %v478_v52 = vsub.f32 1.5, %v477_v62  ;;  %1007 = vmatpush.xpose.msk.msra.mxu0 %vm62_vm0, %v326_v33  ;;  %v325_v49 = vmul.f32 %v237_v41, %v1490_v46  ;;  %vm481_vm9 = vweird.f32 %v1895_v58  ;;  %v210_v17 = vmul.f32 %v1944_v24, %v209_v10  ;;  %vm2020_vm11 = vmor %vm490_vm7, %vm491_vm8 }
  0xba   :  { %v102_v51 = vpop.xlane.xlu2 %101  ;;  %v222_v53 = vsub.f32 1.5, %v221_v5  ;;  %v1978_v57 = vpop.eup %1108  ;;  %v1985_v32 = vadd.f32 1e-12, %v361_v27  ;;  %v1987_v16 = vadd.f32 1e-12, %v105_v13  ;;  %v503_v42 = vsel %vm502_vm6, %v1828_v7, %v499_v9 }
  0xbb   :  { %v465_v38 = vmul.f32 %v1978_v57, %v1932_v22  ;;  %vm225_vm10 = vweird.f32 %v1922_v2  ;;  %v582_v14 = vmul.f32 %v503_v42, %v1485_v45  ;;  %v2009_v20 = vadd.f32 1e-12, %v102_v51 }
  0xbc   :  { %1114 = vrsqrt.f32 %v1985_v32  ;;  %v2007_v21 = vpop.eup %1110  ;;  %v489_v46 = vmul.f32 %v1861_v26, %v488_v61  ;;  %v223_v39 = vmul.f32 %v1922_v2, %v222_v53  ;;  %v479_v7 = vmul.f32 %v1895_v58, %v478_v52 }
  0xbd   :  { %v466_v12 = vmul.f32 %v1978_v57, %v465_v38  ;;  %1116 = vrsqrt.f32 %v1987_v16  ;;  %v2014_v60 = vpop.eup %1112  ;;  %vm480_vm12 = vweird.f32 %v1841_v50  ;;  %vm224_vm13 = vweird.f32 %v1843_v40  ;;  %1008 = vmatpush.xpose.msk.msra.mxu0 %vm62_vm0, %v325_v49  ;;  %1025 = vmatpush.xpose.msk.msra.mxu1 %vm62_vm0, %v582_v14 }
  0xbe   :  { %v455_v59 = vmul.f32 %v2007_v21, %v1942_v11  ;;  %v741_v23 = vmul.f32 %v582_v14, %v326_v33  ;;  %vm226_vm14 = vmor %vm224_vm13, %vm225_vm10  ;;  %v211_v1 = vmul.f32 0.5, %v210_v17  ;;  %vm214_vm15 = vweird.f32 %v1880_v28 }
  0xbf   :  { %v199_v50 = vmul.f32 %v2014_v60, %v1948_v18  ;;  %1118 = vrsqrt.f32 %v2009_v20  ;;  %vm482_vm1 = vmor %vm480_vm12, %vm481_vm9  ;;  %v467_v29 = vmul.f32 0.5, %v466_v12  ;;  %v493_v35 = vsel %vm2020_vm11, %v1861_v26, %v489_v46 }
  0xc0   :  { %v456_v6 = vmul.f32 %v2007_v21, %v455_v59  ;;  %1043 = vmatpush.xpose.msk.msra.mxu2 %vm62_vm0, %v741_v23  ;;  %v227_v44 = vsel %vm226_vm14, %v1922_v2, %v223_v39  ;;  %v581_v62 = vmul.f32 %v493_v35, %v1495_v47  ;;  %v483_v19 = vsel %vm482_vm1, %v1895_v58, %v479_v7 }
  0xc1   :  { %v358_v8 = vpop.xlane.xlu0 %357  ;;  %v99_v30 = vpop.xlane.xlu1 %98  ;;  %v200_v0 = vmul.f32 %v2014_v60, %v199_v50  ;;  %v324_v43 = vmul.f32 %v227_v44, %v1514_v55  ;;  %vm215_vm2 = vweird.f32 %v1944_v24  ;;  %vm470_vm3 = vweird.f32 %v1932_v22 }
  0xc2   :  { %v355_v40 = vpop.xlane.xlu2 %354  ;;  %v2044_v34 = vpop.eup %1114  ;;  %v580_v2 = vmul.f32 %v483_v19, %v1509_v54  ;;  %v212_v36 = vsub.f32 1.5, %v211_v1  ;;  %1026 = vmatpush.xpose.msk.msra.mxu1 %vm62_vm0, %v581_v62  ;;  %v740_v55 = vmul.f32 %v581_v62, %v325_v49  ;;  %v468_v58 = vsub.f32 1.5, %v467_v29  ;;  %vm2085_vm8 = vmor %vm214_vm15, %vm215_vm2 }
  0xc3   :  { %v2050_v37 = vpop.eup %1116  ;;  %v445_v26 = vmul.f32 %v2044_v34, %v1985_v32  ;;  %v201_v31 = vmul.f32 0.5, %v200_v0  ;;  %1009 = vmatpush.xpose.msk.msra.mxu0 %vm62_vm0, %v324_v43  ;;  %v457_v5 = vmul.f32 0.5, %v456_v6  ;;  %v2061_v27 = vadd.f32 1e-12, %v358_v8 }
  0xc4   :  { %v189_v47 = vmul.f32 %v2050_v37, %v1987_v16  ;;  %v2063_v13 = vadd.f32 1e-12, %v355_v40  ;;  %1044 = vmatpush.xpose.msk.msra.mxu2 %vm62_vm0, %v740_v55  ;;  %v2069_v25 = vadd.f32 1e-12, %v99_v30  ;;  %v739_v51 = vmul.f32 %v580_v2, %v324_v43 }
  0xc5   :  { %v2065_v61 = vpop.eup %1118  ;;  %v202_v10 = vsub.f32 1.5, %v201_v31  ;;  %vm471_vm4 = vweird.f32 %v1978_v57  ;;  %v446_v48 = vmul.f32 %v2044_v34, %v445_v26  ;;  %1120 = vrsqrt.f32 %v2061_v27 }
  0xc6   :  { %v190_v54 = vmul.f32 %v2050_v37, %v189_v47  ;;  %v179_v52 = vmul.f32 %v2065_v61, %v2009_v20  ;;  %vm460_vm5 = vweird.f32 %v1942_v11  ;;  %vm204_vm6 = vweird.f32 %v1948_v18  ;;  %1027 = vmatpush.xpose.msk.msra.mxu1 %vm62_vm0, %v580_v2  ;;  %vm2096_vm10 = vmor %vm470_vm3, %vm471_vm4 }
  0xc7   :  { %vm205_vm7 = vweird.f32 %v2014_v60  ;;  %1122 = vrsqrt.f32 %v2063_v13  ;;  %v458_v9 = vsub.f32 1.5, %v457_v5  ;;  %vm461_vm9 = vweird.f32 %v2007_v21 }
  0xc8   :  { %v180_v38 = vmul.f32 %v2065_v61, %v179_v52  ;;  %1124 = vrsqrt.f32 %v2069_v25  ;;  %vm451_vm11 = vweird.f32 %v2044_v34  ;;  %v191_v28 = vmul.f32 0.5, %v190_v54  ;;  %1045 = vmatpush.xpose.msk.msra.mxu2 %vm62_vm0, %v739_v51  ;;  %vm2110_vm13 = vmor %vm204_vm6, %vm205_vm7 }
  0xc9   :  { %v352_v53 = vpop.xlane.xlu1 %351  ;;  %v96_v33 = vpop.xlane.xlu0 %95  ;;  %vm194_vm12 = vweird.f32 %v1987_v16  ;;  %v213_v42 = vmul.f32 %v1944_v24, %v212_v36  ;;  %v203_v12 = vmul.f32 %v2014_v60, %v202_v10  ;;  %v469_v14 = vmul.f32 %v1978_v57, %v468_v58  ;;  %vm462_vm4 = vmor %vm460_vm5, %vm461_vm9 }
  0xca   :  { %v65_v49 = vpop.xlane.xlu2 %64  ;;  %v447_v46 = vmul.f32 0.5, %v446_v48  ;;  %v181_v39 = vmul.f32 0.5, %v180_v38  ;;  %v2114_v7 = vadd.f32 1e-12, %v352_v53  ;;  %v2116_v45 = vadd.f32 1e-12, %v96_v33 }
  0xcb   :  { %vm450_vm14 = vweird.f32 %v1985_v32  ;;  %v217_v59 = vsel %vm2085_vm8, %v1944_v24, %v213_v42  ;;  %v207_v18 = vsel %vm2110_vm13, %v2014_v60, %v203_v12  ;;  %v473_v23 = vsel %vm2096_vm10, %v1978_v57, %v469_v14  ;;  %v2130_v30 = vpop.eup %1120 }
  0xcc   :  { %v2128_v8 = vadd.f32 1e-12, %v65_v49  ;;  %vm195_vm15 = vweird.f32 %v2050_v37  ;;  %v323_v1 = vmul.f32 %v217_v59, %v1519_v56  ;;  %v579_v50 = vmul.f32 %v473_v23, %v1533_v63 }
  0xcd   :  { %v459_v24 = vmul.f32 %v2007_v21, %v458_v9  ;;  %v2136_v40 = vpop.eup %1122  ;;  %v192_v29 = vsub.f32 1.5, %v191_v28  ;;  %vm184_vm1 = vweird.f32 %v2009_v20  ;;  %vm185_vm2 = vweird.f32 %v2065_v61  ;;  %vm2172_vm8 = vmor %vm194_vm12, %vm195_vm15 }
  0xce   :  { %v435_v57 = vmul.f32 %v2130_v30, %v2061_v27  ;;  %1126 = vrsqrt.f32 %v2114_v7  ;;  %v2143_v60 = vpop.eup %1124  ;;  %v448_v6 = vsub.f32 1.5, %v447_v46  ;;  %vm440_vm3 = vweird.f32 %v2061_v27  ;;  %1010 = vmatpush.xpose.msk.msra.mxu0 %vm62_vm0, %v323_v1  ;;  %1028 = vmatpush.xpose.msk.msra.mxu1 %vm62_vm0, %v579_v50  ;;  %vm2194_vm12 = vmor %vm450_vm14, %vm451_vm11 }
  0xcf   :  { %v425_v56 = vmul.f32 %v2136_v40, %v2063_v13  ;;  %v322_v63 = vmul.f32 %v207_v18, %v1538_v3  ;;  %1128 = vrsqrt.f32 %v2116_v45  ;;  %v182_v35 = vsub.f32 1.5, %v181_v39  ;;  %vm2214_vm11 = vmor %vm184_vm1, %vm185_vm2 }
  0xd0   :  { %v436_v44 = vmul.f32 %v2130_v30, %v435_v57  ;;  %v169_v0 = vmul.f32 %v2143_v60, %v2069_v25  ;;  %vm174_vm6 = vweird.f32 %v2069_v25  ;;  %1130 = vrsqrt.f32 %v2128_v8 }
  0xd1   :  { %vm441_vm7 = vweird.f32 %v2130_v30  ;;  %v426_v3 = vmul.f32 %v2136_v40, %v425_v56  ;;  %v738_v62 = vmul.f32 %v579_v50, %v323_v1  ;;  %v463_v43 = vsel %vm462_vm4, %v2007_v21, %v459_v24 }
  0xd2   :  { %v437_v19 = vmul.f32 0.5, %v436_v44  ;;  %vm430_vm5 = vweird.f32 %v2063_v13  ;;  %v170_v11 = vmul.f32 %v2143_v60, %v169_v0  ;;  %v578_v26 = vmul.f32 %v463_v43, %v1543_v4  ;;  %1011 = vmatpush.xpose.msk.msra.mxu0 %vm62_vm0, %v322_v63  ;;  %vm2231_vm1 = vmor %vm440_vm3, %vm441_vm7 }
  0xd3   :  { %v193_v2 = vmul.f32 %v2050_v37, %v192_v29  ;;  %v427_v31 = vmul.f32 0.5, %v426_v3  ;;  %vm431_vm9 = vweird.f32 %v2136_v40  ;;  %vm175_vm10 = vweird.f32 %v2143_v60  ;;  %1046 = vmatpush.xpose.msk.msra.mxu2 %vm62_vm0, %v738_v62  ;;  %v1147_v29 = vld [vmem:[%s2351_s2 + $0x10] sm:$0xff] }
  0xd4   :  { %v449_v4 = vmul.f32 %v2044_v34, %v448_v6  ;;  %v2181_v21 = vpop.eup %1126  ;;  %v438_v47 = vsub.f32 1.5, %v437_v19  ;;  %v171_v55 = vmul.f32 0.5, %v170_v11  ;;  %1029 = vmatpush.xpose.msk.msra.mxu1 %vm62_vm0, %v578_v26  ;;  %v183_v58 = vmul.f32 %v2065_v61, %v182_v35  ;;  %vm2245_vm2 = vmor %vm174_vm6, %vm175_vm10  ;;  %v1148_v35 = vld [vmem:[%s2351_s2 + $0x8] sm:$0xff]  ;;  %v1150_v19 = vld [vmem:[%s2350_s1] sm:$0xff] }
  0xd5   :  { %v197_v16 = vsel %vm2172_vm8, %v2050_v37, %v193_v2  ;;  %v2188_v5 = vpop.eup %1128  ;;  %v415_v54 = vmul.f32 %v2181_v21, %v2114_v7  ;;  %vm420_vm13 = vweird.f32 %v2114_v7  ;;  %vm73_vm15 = vweird.f32 %v2128_v8  ;;  %vm2265_vm3 = vmor %vm430_vm5, %vm431_vm9  ;;  %v1151_v2 = vld [vmem:[%s2349_s0] sm:$0xff]  ;;  %s1306_s0 = smov [#allocation2]  }
  0xd6   :  { %v737_v37 = vmul.f32 %v578_v26, %v322_v63  ;;  %v321_v51 = vmul.f32 %v197_v16, %v1560_v15  ;;  %v2203_v48 = vpop.eup %1130  ;;  %v428_v52 = vsub.f32 1.5, %v427_v31  ;;  %v172_v53 = vsub.f32 1.5, %v171_v55  ;;  %s911_s28 = sshll.u32 %s1306_s0, 4  ;;  %s957_s0 = sshll.u32 %s2357_s8, 4  ;;  %s912_s28 = int_to_ptr.vmem [resolvable:$true] %s911_s28  ;;  %s958_s0 = int_to_ptr.hbm [resolvable:$true] %s957_s0 }
  0xd7   :  { %v159_v32 = vmul.f32 %v2188_v5, %v2116_v45  ;;  %v453_v33 = vsel %vm2194_vm12, %v2044_v34, %v449_v4  ;;  %v416_v15 = vmul.f32 %v2181_v21, %v415_v54  ;;  %vm421_vm14 = vweird.f32 %v2181_v21  ;;  %v1144_v34 = vld [vmem:[%s2351_s2 + $0x18] sm:$0xff] }
  0xd8   :  { %v68_v9 = vmul.f32 %v2203_v48, %v2128_v8  ;;  %1047 = vmatpush.xpose.msk.msra.mxu2 %vm62_vm0, %v737_v37  ;;  %1012 = vmatpush.xpose.msk.msra.mxu0 %vm62_vm0, %v321_v51  ;;  %v577_v20 = vmul.f32 %v1144_v34, %v453_v33  ;;  %v187_v17 = vsel %vm2214_vm11, %v2065_v61, %v183_v58  ;;  %v1145_v61 = vld [vmem:[%s2350_s1 + $0x10] sm:$0xff]  ;;  %vm165_vm4 = vweird.f32 %v2188_v5  ;;  %vm422_vm7 = vmor %vm420_vm13, %vm421_vm14 }
  0xd9   :  { %v160_v49 = vmul.f32 %v2188_v5, %v159_v32  ;;  %v173_v28 = vmul.f32 %v2143_v60, %v172_v53  ;;  %v439_v42 = vmul.f32 %v2130_v30, %v438_v47  ;;  %v417_v12 = vmul.f32 0.5, %v416_v15  ;;  %v2323_v47 = vld [vmem:[%s2352_s3] sm:$0xff]  ;;  %s1307_s3 = smov [#allocation4]  }
  0xda   :  { %v69_v14 = vmul.f32 %v2203_v48, %v68_v9  ;;  %1030 = vmatpush.xpose.msk.msra.mxu1 %vm62_vm0, %v577_v20  ;;  %v736_v22 = vmul.f32 %v577_v20, %v321_v51  ;;  %v320_v46 = vmul.f32 %v1145_v61, %v187_v17  ;;  %v429_v18 = vmul.f32 %v2136_v40, %v428_v52  ;;  %s922_s11 = sshll.u32 %s1307_s3, 4  ;;  %s923_s11 = int_to_ptr.vmem [resolvable:$true] %s922_s11 }
  0xdb   :  { %v161_v39 = vmul.f32 0.5, %v160_v49  ;;  %v177_v25 = vsel %vm2245_vm2, %v2143_v60, %v173_v28  ;;  %v443_v59 = vsel %vm2231_vm1, %v2130_v30, %v439_v42  ;;  %v418_v1 = vsub.f32 1.5, %v417_v12  ;;  %v1146_v30 = vld [vmem:[%s2350_s1 + $0x8] sm:$0xff] }
  0xdc   :  { %v70_v50 = vmul.f32 0.5, %v69_v14  ;;  %1048 = vmatpush.xpose.msk.msra.mxu2 %vm62_vm0, %v736_v22  ;;  %1013 = vmatpush.xpose.msk.msra.mxu0 %vm62_vm0, %v320_v46  ;;  %v319_v24 = vmul.f32 %v1146_v30, %v177_v25  ;;  %v576_v13 = vmul.f32 %v1147_v29, %v443_v59  ;;  %vm74_vm6 = vweird.f32 %v2203_v48 }
  0xdd   :  { %v162_v57 = vsub.f32 1.5, %v161_v39  ;;  %v433_v60 = vsel %vm2265_vm3, %v2136_v40, %v429_v18  ;;  %v419_v6 = vmul.f32 %v2181_v21, %v418_v1  ;;  %vm164_vm5 = vweird.f32 %v2116_v45  ;;  %vm75_vm9 = vmor %vm73_vm15, %vm74_vm6  ;;  %v1149_v45 = vld [vmem:[%s2351_s2] sm:$0xff] }
  0xde   :  { %v71_v56 = vsub.f32 1.5, %v70_v50  ;;  %1031 = vmatpush.xpose.msk.msra.mxu1 %vm62_vm0, %v576_v13  ;;  %v735_v63 = vmul.f32 %v576_v13, %v320_v46  ;;  %v575_v44 = vmul.f32 %v1148_v35, %v433_v60  ;;  %vm166_vm8 = vmor %vm164_vm5, %vm165_vm4  ;;  %v1304_v31 = vmov 1.0  }
  0xdf   :  { %v163_v0 = vmul.f32 %v2188_v5, %v162_v57  ;;  %v423_v3 = vsel %vm422_vm7, %v2181_v21, %v419_v6  ;;  %v827_v4 = vlaneseq  ;;  %v863_v55 = vsub.f32 1.0, %v2323_v47 }
  0xe0   :  { %v72_v40 = vmul.f32 %v2203_v48, %v71_v56  ;;  %1014 = vmatpush.xpose.msk.msra.mxu0 %vm62_vm0, %v319_v24  ;;  %1049 = vmatpush.xpose.msk.msra.mxu2 %vm62_vm0, %v735_v63  ;;  %v574_v62 = vmul.f32 %v1149_v45, %v423_v3  ;;  %v734_v43 = vmul.f32 %v575_v44, %v319_v24  ;;  %v1305_v16 = vmov 0.0  }
  0xe1   :  { %v167_v7 = vsel %vm166_vm8, %v2188_v5, %v163_v0  ;;  %v828_v21 = vand.u32 127, %v827_v4  ;;  %v891_v29 = vrot.slane %v2323_v47, 4 }
  0xe2   :  { %1032 = vmatpush.xpose.msk.msra.mxu1 %vm62_vm0, %v575_v44  ;;  %v318_v11 = vmul.f32 %v1150_v19, %v167_v7  ;;  %v76_v26 = vsel %vm75_vm9, %v2203_v48, %v72_v40  ;;  %v1055_v48 = vadd.f32 -1.0, %v2323_v47 }
  0xe3   :  { %v77_v36 = vmul.f32 %v1151_v2, %v76_v26  ;;  %vm832_vm10 = vcmp.lt.s32.totalorder %v828_v21, 8  ;;  %v892_v60 = vadd.f32 %v891_v29, %v2323_v47 }
  0xe4   :  { %1050 = vmatpush.xpose.msk.msra.mxu2 %vm62_vm0, %v734_v43  ;;  %1015 = vmatpush.xpose.msk.msra.mxu0 %vm62_vm0, %v318_v11  ;;  %v733_v8 = vmul.f32 %v574_v62, %v318_v11  ;;  %v1054_v58 = vsel %vm832_vm10, 1.0, %v1305_v16  ;;  %v837_v15 = vmul.f32 1e+30, %v1055_v48 }
  0xe5   :  { %v864_v5 = vmul.f32 %v1054_v58, %v863_v55  ;;  %v893_v6 = vrot.slane %v892_v60, 2 }
  0xe6   :  { %1033 = vmatpush.xpose.msk.msra.mxu1 %vm62_vm0, %v574_v62 }
  0xe7   :  { %1016 = vmatmul.msk.f32.vlgmr.msra.gmra.mxu0 %vm62_vm0, %v77_v36  ;;  %v1056_v52 = vadd.f32 -1.0, %v864_v5  ;;  %v894_v56 = vadd.f32 %v893_v6, %v892_v60 }
  0xe8   :  { %1051 = vmatpush.xpose.msk.msra.mxu2 %vm62_vm0, %v733_v8 }
  0xe9   :  { %1034 = vmatmul.msk.f32.vlgmr.msra.gmra.mxu1 %vm62_vm0, %v77_v36  ;;  %v866_v9 = vmul.f32 1e+30, %v1056_v52  ;;  %v895_v35 = vrot.slane %v894_v56, 1 }
  0xeb   :  { %1052 = vmatmul.msk.f32.vlgmr.msra.gmra.mxu2 %vm62_vm0, %v1304_v31  ;;  %v896_v3 = vadd.f32 %v895_v35, %v894_v56 }
  0xed   :  { %vm897_vm12 = vcmp.gt.f32.partialorder %v896_v3, 0.0 }
  0xee   :  { %v1057_v11 = vsel %vm897_vm12, 1.0, %v1305_v16 }
  0xef   :  { %905 = vst [vmem:[#allocation10] sm:$0x1] %v1057_v11 }
  0xf0   :  { %971 = dma.vmem_to_hbm [thread:$0]  %s967_s6, 16, %s969_s21, [#allocation11]  }
 0x164   :  { %v658_v10 = vpop.f32.mrf.mxu0 }
 0x165   :  { %v1017_v53 = vclamps-f32 %v658_v10, 1.0 }
 0x166   :  { %v728_v51 = vpop.f32.mrf.mxu1 }
 0x167   :  { %v1035_v33 = vclamps-f32 %v728_v51, 1.0 }
 0x16e   :  { %v817_v54 = vpop.f32.mrf.mxu2 }
 0x16f   :  { %v1053_v37 = vclamps-f32 %v817_v54, 1.0 }
 0x171   :  { %v822_v32 = vperm.slane %v1053_v37, 0  ;;  %900 = vst [vmem:[#allocation2] sm:$0x1] %v1053_v37 }
 0x172   :  { %916 = dma.vmem_to_hbm [thread:$0]  %s912_s28, 16, %s914_s10, [#allocation3]  }
 0x173   :  { %v823_v41 = vsub.f32 %v1017_v53, %v822_v32  ;;  %vm824_vm0 = vcmp.gt.f32.partialorder %v1017_v53, %v822_v32 }
 0x175   :  { %v825_v34 = vsel %vm824_vm0, %v1035_v33, %v823_v41  ;;  %v826_v20 = vsel %vm824_vm0, %v823_v41, %v1035_v33 }
 0x176   :  { %v835_v38 = vmul.f32 -64.0, %v825_v34  ;;  %901 = vst [vmem:[#allocation4] sm:$0xff] %v825_v34  ;;  %v862_v49 = vmul.f32 64.0, %v826_v20 }
 0x177   :  { %927 = dma.vmem_to_hbm [thread:$0]  %s923_s11, 128, %s925_s14, [#allocation5]   ;;  %902 = vst [vmem:[#allocation6] sm:$0xff] %v826_v20 }
 0x178   :  { %v838_v17 = vadd.f32 %v837_v15, %v835_v38  ;;  %v867_v28 = vadd.f32 %v866_v9, %v862_v49  ;;  %938 = dma.vmem_to_hbm [thread:$0]  %s934_s15, 128, %s936_s18, [#allocation5]  }
 0x17a   :  { %v839_v42 = vrot.slane %v838_v17, 4  ;;  %v868_v27 = vrot.slane %v867_v28, 4 }
 0x17c   :  { %v840_v12 = vmax.f32 %v838_v17, %v839_v42  ;;  %v869_v14 = vmax.f32 %v867_v28, %v868_v27 }
 0x17e   :  { %v841_v22 = vrot.slane %v840_v12, 2  ;;  %v870_v61 = vrot.slane %v869_v14, 2 }
 0x180   :  { %v842_v46 = vmax.f32 %v840_v12, %v841_v22  ;;  %v871_v39 = vmax.f32 %v869_v14, %v870_v61 }
 0x182   :  { %v843_v25 = vrot.slane %v842_v46, 1  ;;  %v872_v59 = vrot.slane %v871_v39, 1 }
 0x184   :  { %v844_v18 = vmax.f32 %v842_v46, %v843_v25  ;;  %v873_v23 = vmax.f32 %v871_v39, %v872_v59 }
 0x186   :  { %v845_v1 = vmax.f32 %v844_v18, 0.0  ;;  %v874_v50 = vmax.f32 %v873_v23, 0.0 }
 0x188   :  { %v846_v30 = vsub.f32 %v838_v17, %v845_v1  ;;  %v875_v24 = vsub.f32 %v867_v28, %v874_v50  ;;  %v855_v63 = vsub.f32 0.0, %v845_v1  ;;  %v884_v0 = vsub.f32 0.0, %v874_v50 }
 0x18a   :  { %v847_v13 = vmul.f32 1.442695, %v846_v30  ;;  %v876_v57 = vmul.f32 1.442695, %v875_v24  ;;  %v856_v45 = vmul.f32 1.442695, %v855_v63 }
 0x18b   :  { %v885_v19 = vmul.f32 1.442695, %v884_v0 }
 0x18c   :  { %1132 = vpow2.f32 %v847_v13 }
 0x18d   :  { %1134 = vpow2.f32 %v876_v57 }
 0x18e   :  { %1136 = vpow2.f32 %v856_v45 }
 0x18f   :  { %1138 = vpow2.f32 %v885_v19 }
 0x192   :  { %v1133_v44 = vpop.eup %1132 }
 0x193   :  { %v849_v40 = vrot.slane %v1133_v44, 4  ;;  %v1135_v7 = vpop.eup %1134 }
 0x194   :  { %v878_v43 = vrot.slane %v1135_v7, 4  ;;  %v1137_v55 = vpop.eup %1136 }
 0x195   :  { %v850_v62 = vadd.f32 %v1133_v44, %v849_v40  ;;  %v1139_v10 = vpop.eup %1138 }
 0x196   :  { %v879_v8 = vadd.f32 %v1135_v7, %v878_v43 }
 0x197   :  { %v851_v26 = vrot.slane %v850_v62, 2 }
 0x198   :  { %v880_v36 = vrot.slane %v879_v8, 2 }
 0x199   :  { %v852_v2 = vadd.f32 %v851_v26, %v850_v62 }
 0x19a   :  { %v881_v4 = vadd.f32 %v880_v36, %v879_v8 }
 0x19b   :  { %v853_v31 = vrot.slane %v852_v2, 1 }
 0x19c   :  { %v882_v47 = vrot.slane %v881_v4, 1 }
 0x19d   :  { %v854_v21 = vadd.f32 %v853_v31, %v852_v2 }
 0x19e   :  { %v883_v5 = vadd.f32 %v882_v47, %v881_v4 }
 0x19f   :  { %v858_v58 = vadd.f32 %v1137_v55, %v854_v21 }
 0x1a0   :  { %v887_v54 = vadd.f32 %v1139_v10, %v883_v5 }
 0x1a1   :  { %1140 = vlog2.f32 %v858_v58 }
 0x1a2   :  { %1142 = vlog2.f32 %v887_v54 }
 0x1a7   :  { %v1141_v16 = vpop.eup %1140 }
 0x1a8   :  { %v860_v37 = vmul.f32 0.6931472, %v1141_v16  ;;  %v1143_v51 = vpop.eup %1142 }
 0x1a9   :  { %v889_v52 = vmul.f32 0.6931472, %v1143_v51 }
 0x1aa   :  { %v861_v48 = vadd.f32 %v860_v37, %v845_v1 }
 0x1ab   :  { %v890_v53 = vadd.f32 %v889_v52, %v874_v50 }
 0x1ac   :  { %903 = vst [vmem:[#allocation7] sm:$0x1] %v861_v48 }
 0x1ad   :  { %949 = dma.vmem_to_hbm [thread:$0]  %s945_s22, 16, %s947_s25, [#allocation8]   ;;  %904 = vst [vmem:[#allocation9] sm:$0x1] %v890_v53 }
 0x1ae   :  { %960 = dma.vmem_to_hbm [thread:$0]  %s956_s27, 16, %s958_s0, [#allocation8]  }
 0x1af   :  { %1296 = dma.done.wait [#allocation3], 16  }
 0x1b0   :  { %1297 = vsyncadd [#allocation3], 4294967280 }
 0x1b1   :  { %1298 = dma.done.wait [#allocation5], 256  }
 0x1b2   :  { %1299 = vsyncadd [#allocation5], 4294967040 }
 0x1b3   :  { %1300 = dma.done.wait [#allocation8], 32  }
 0x1b4   :  { %1301 = vsyncadd [#allocation8], 4294967264 }
 0x1b5   :  { %1302 = dma.done.wait [#allocation11], 16  }
 0x1b6   :  { %1303 = vsyncadd [#allocation11], 4294967280 }
 0x1b7   :  { %996 = vsyncpa [#allocation3], 1 }
 0x1b8   :  { %997 = vsyncpa [#allocation5], 1 }
 0x1b9   :  { %998 = vsyncpa [#allocation8], 1 }
 0x1ba   :  { %999 = vsyncpa [#allocation11], 1 }

</bundles_post_ra>
